<compile_context>
chip_gen: v7x
topology: tpu7x:2x2x1
jax: 0.10.0
libtpu: 0.0.40
codegen_flags: <defaults>
</compile_context>

<pallas_src>
import jax
import jax.numpy as jnp
from jax import lax
from jax.experimental import pallas as pl
from jax.experimental.pallas import tpu as pltpu


def disc_kernel(x_ref, w1_ref, b1_ref, w2_ref, b2_ref, o_ref):
    # Layer 1 on the MXU, batch on lanes: (H, F) contracted with (TB, F) on F
    # -> (H, TB), f32 accumulation.  Relayout of the x tile stays in-kernel.
    h = lax.dot_general(
        w1_ref[...], x_ref[...],
        dimension_numbers=(((1,), (1,)), ((), ())),
        preferred_element_type=jnp.float32)
    h = h + b1_ref[...]                    # (H, 1) bias broadcast along lanes (VPU)
    h = jnp.maximum(h, 0.1 * h)            # LeakyReLU(0.1): vmul + vmax

    # Layer 2 (H -> 1) also on the MXU: (1, H) @ (H, TB) -> (1, TB), lane-dense.
    z = jnp.dot(w2_ref[...], h, preferred_element_type=jnp.float32)
    z = z + b2_ref[0, 0]                   # scalar bias read from SMEM

    # Sigmoid: exp on the EUP, exact reciprocal (keeps 1e-5 accuracy).
    o_ref[...] = pl.reciprocal(1.0 + jnp.exp(-z), approx=False).astype(o_ref.dtype)


def discriminator_forward(x, w1, b1, w2, b2, *, batch_tile=8192, min_grid_steps=1):
    """Forward pass of the Discriminator.

    x : (B, F) activations
    w1: (H, F)  b1: (H,)    -- PyTorch nn.Linear(F, H) layout
    w2: (1, H)  b2: (1,)    -- PyTorch nn.Linear(H, 1) layout
    returns (B, 1) float32 in [0, 1]

    batch_tile     : lane-width of one batch tile (rounded down to 128s).
                     8192 keeps VMEM use ~7 MiB (fits v5e's 16 MiB scoped
                     default and v7x's 64 MiB physical VMEM with headroom).
    min_grid_steps : set to 2 on v7x so the "parallel" batch axis shards
                     across both TensorCores even when B fits one tile.
    """
    B, F = x.shape
    H = w1.shape[0]

    # Tile selection: as large as possible (amortize ~0.35 us per grid step),
    # optionally capped so the grid has >= min_grid_steps steps.
    tile = max(128, (batch_tile // 128) * 128)
    if min_grid_steps > 1 and B > 128:
        per_step = -(-B // min_grid_steps)            # ceil(B / steps)
        per_step = -(-per_step // 128) * 128          # round up to lane multiple
        tile = min(tile, per_step)

    if B <= tile:
        TB = B          # single full-extent block: (8,128) constraint waived
    else:
        TB = tile       # multiple of 128; last block is boundary-masked
    grid = (pl.cdiv(B, TB),)

    out = pl.pallas_call(
        disc_kernel,
        out_shape=jax.ShapeDtypeStruct((1, B), jnp.float32),
        grid=grid,
        in_specs=[
            pl.BlockSpec((TB, F), lambda i: (i, 0)),    # x batch tile (streamed)
            pl.BlockSpec((H, F), lambda i: (0, 0)),     # W1, resident in VMEM
            pl.BlockSpec((H, 1), lambda i: (0, 0)),     # b1 column, resident
            pl.BlockSpec((1, H), lambda i: (0, 0)),     # w2 row, resident
            pl.BlockSpec(memory_space=pltpu.MemorySpace.SMEM),  # b2 scalar (1,1)
        ],
        out_specs=pl.BlockSpec((1, TB), lambda i: (0, i)),      # lane-dense output
        compiler_params=pltpu.CompilerParams(
            dimension_semantics=("parallel",)),
    )(x, w1, b1.reshape(H, 1), w2, b2.reshape(1, 1))

    # (1, B) -> (B, 1); no padded columns to strip (out_shape is exact).
    return out.reshape(B, 1)


def reference_forward(x, w1, b1, w2, b2):
    h = x @ w1.T + b1
    h = jnp.where(h > 0, h, 0.1 * h)
    z = h @ w2.T + b2
    return 1.0 / (1.0 + jnp.exp(-z))


if __name__ == "__main__":
    key = jax.random.PRNGKey(0)
    k_x, k_w1, k_b1, k_w2, k_b2, k_x2 = jax.random.split(key, 6)

    in_features = 32
    hidden = 128

    # Deterministic init mimicking nn.Linear's U(-1/sqrt(fan_in), 1/sqrt(fan_in)),
    # kept in PyTorch weight layout: w1 (H, F), w2 (1, H).
    lim1 = 1.0 / jnp.sqrt(jnp.float32(in_features))
    w1 = jax.random.uniform(k_w1, (hidden, in_features), jnp.float32, -lim1, lim1)
    b1 = jax.random.uniform(k_b1, (hidden,), jnp.float32, -lim1, lim1)
    lim2 = 1.0 / jnp.sqrt(jnp.float32(hidden))
    w2 = jax.random.uniform(k_w2, (1, hidden), jnp.float32, -lim2, lim2)
    b2 = jax.random.uniform(k_b2, (1,), jnp.float32, -lim2, lim2)

    # Small batch: single full-extent block.
    batch = 8
    x = jax.random.normal(k_x, (batch, in_features), dtype=jnp.float32)
    out = discriminator_forward(x, w1, b1, w2, b2)
    jax.block_until_ready(out)
    ref = reference_forward(x, w1, b1, w2, b2)
    assert out.shape == (batch, 1)
    assert jnp.allclose(out, ref, atol=1e-5, rtol=1e-5)

    # Non-multiple batch with a deliberately tiny tile: exercises the multi-step
    # grid + masked out-of-bounds last block (production default stays 8192).
    batch2 = 1000
    x2 = jax.random.normal(k_x2, (batch2, in_features), dtype=jnp.float32)
    out2 = discriminator_forward(x2, w1, b1, w2, b2, batch_tile=256)
    jax.block_until_ready(out2)
    ref2 = reference_forward(x2, w1, b1, w2, b2)
    assert out2.shape == (batch2, 1)
    assert jnp.allclose(out2, ref2, atol=1e-5, rtol=1e-5)

    # v7x-style config: force >= 2 "parallel" steps so both TensorCores get work.
    out3 = discriminator_forward(x2, w1, b1, w2, b2, min_grid_steps=2)
    jax.block_until_ready(out3)
    assert jnp.allclose(out3, ref2, atol=1e-5, rtol=1e-5)

    print("KERNEL_OK")
</pallas_src>

<mosaic_0001>
module attributes {stable_mosaic.version = 11 : i64} {
  func.func @disc_kernel(%arg0: i32, %arg1: memref<8x32xf32, #tpu.memory_space<vmem>>, %arg2: memref<128x32xf32, #tpu.memory_space<vmem>>, %arg3: memref<128x1xf32, #tpu.memory_space<vmem>>, %arg4: memref<1x128xf32, #tpu.memory_space<vmem>>, %arg5: memref<1x1xf32, #tpu.memory_space<smem>>, %arg6: memref<1x8xf32, #tpu.memory_space<vmem>>) attributes {dimension_semantics = [#tpu.dimension_semantics<parallel>], iteration_bounds = array<i64: 1>, scalar_prefetch = 0 : i64, scratch_operands = 0 : i64, tpu.core_type = #tpu.core_type<tc>, window_params = [{transform_indices = @transform_0, window_bounds = array<i64: 8, 32>}, {pipeline_mode = #tpu.pipeline_mode<synchronous>, transform_indices = @transform_1, window_bounds = array<i64: 128, 32>}, {pipeline_mode = #tpu.pipeline_mode<synchronous>, transform_indices = @transform_2, window_bounds = array<i64: 128, 1>}, {pipeline_mode = #tpu.pipeline_mode<synchronous>, transform_indices = @transform_3, window_bounds = array<i64: 1, 128>}, {transform_indices = @transform_4, window_bounds = array<i64: 1, 1>}, {transform_indices = @transform_5, window_bounds = array<i64: 1, 8>}]} {
    %c0 = arith.constant 0 : index
    %c0_0 = arith.constant 0 : index
    %0 = vector.load %arg2[%c0, %c0_0] : memref<128x32xf32, #tpu.memory_space<vmem>>, vector<128x32xf32>
    %c0_1 = arith.constant 0 : index
    %c0_2 = arith.constant 0 : index
    %1 = vector.load %arg1[%c0_1, %c0_2] : memref<8x32xf32, #tpu.memory_space<vmem>>, vector<8x32xf32>
    %cst = arith.constant dense<0.000000e+00> : vector<128x8xf32>
    %2 = tpu.matmul %0, %1, %cst {dimension_numbers = #tpu.dot_dimension_numbers<[1], [1], [0], [0], [0, 0, 1, 0], [], []>} : vector<128x32xf32>, vector<8x32xf32>, vector<128x8xf32> -> vector<128x8xf32>
    %c0_3 = arith.constant 0 : index
    %c0_4 = arith.constant 0 : index
    %3 = vector.load %arg3[%c0_3, %c0_4] : memref<128x1xf32, #tpu.memory_space<vmem>>, vector<128x1xf32>
    %4 = vector.broadcast %3 : vector<128x1xf32> to vector<128x8xf32>
    %5 = arith.addf %2, %4 : vector<128x8xf32>
    %cst_5 = arith.constant 1.000000e-01 : f32
    %6 = vector.broadcast %cst_5 : f32 to vector<128x8xf32>
    %7 = arith.mulf %6, %5 : vector<128x8xf32>
    %8 = arith.maximumf %5, %7 : vector<128x8xf32>
    %c0_6 = arith.constant 0 : index
    %c0_7 = arith.constant 0 : index
    %9 = vector.load %arg4[%c0_6, %c0_7] : memref<1x128xf32, #tpu.memory_space<vmem>>, vector<1x128xf32>
    %cst_8 = arith.constant dense<0.000000e+00> : vector<1x8xf32>
    %10 = tpu.matmul %9, %8, %cst_8 {dimension_numbers = #tpu.dot_dimension_numbers<[1], [0], [0], [1], [0, 0, 1, 1], [], []>} : vector<1x128xf32>, vector<128x8xf32>, vector<1x8xf32> -> vector<1x8xf32>
    %c0_9 = arith.constant 0 : index
    %c0_10 = arith.constant 0 : index
    %11 = memref.load %arg5[%c0_9, %c0_10] : memref<1x1xf32, #tpu.memory_space<smem>>
    %12 = vector.broadcast %11 : f32 to vector<1x8xf32>
    %13 = arith.addf %10, %12 : vector<1x8xf32>
    %cst_11 = arith.constant 0.000000e+00 : f32
    %14 = vector.broadcast %cst_11 : f32 to vector<1x8xf32>
    %15 = arith.subf %14, %13 : vector<1x8xf32>
    %16 = math.exp %15 : vector<1x8xf32>
    %cst_12 = arith.constant 1.000000e+00 : f32
    %17 = vector.broadcast %cst_12 : f32 to vector<1x8xf32>
    %18 = arith.addf %17, %16 : vector<1x8xf32>
    %19 = tpu.reciprocal %18 : vector<1x8xf32> -> vector<1x8xf32>
    %c0_13 = arith.constant 0 : index
    %c0_14 = arith.constant 0 : index
    %20 = vector.load %arg6[%c0_13, %c0_14] : memref<1x8xf32, #tpu.memory_space<vmem>>, vector<1x8xf32>
    tpu.vector_store %arg6[%c0_13, %c0_14], %19 {strides = array<i32>} : memref<1x8xf32, #tpu.memory_space<vmem>>, vector<1x8xf32>,
    return
  }
  func.func @transform_0(%arg0: i32) -> (i32, i32) {
    %c0_i32 = arith.constant 0 : i32
    %c0_i32_0 = arith.constant 0 : i32
    return %arg0, %c0_i32 : i32, i32
  }
  func.func @transform_1(%arg0: i32) -> (i32, i32) {
    %c0_i32 = arith.constant 0 : i32
    %c0_i32_0 = arith.constant 0 : i32
    %c0_i32_1 = arith.constant 0 : i32
    return %c0_i32, %c0_i32_0 : i32, i32
  }
  func.func @transform_2(%arg0: i32) -> (i32, i32) {
    %c0_i32 = arith.constant 0 : i32
    %c0_i32_0 = arith.constant 0 : i32
    %c0_i32_1 = arith.constant 0 : i32
    return %c0_i32, %c0_i32_0 : i32, i32
  }
  func.func @transform_3(%arg0: i32) -> (i32, i32) {
    %c0_i32 = arith.constant 0 : i32
    %c0_i32_0 = arith.constant 0 : i32
    %c0_i32_1 = arith.constant 0 : i32
    return %c0_i32, %c0_i32_0 : i32, i32
  }
  func.func @transform_4(%arg0: i32) -> (i32, i32) {
    %c0_i32 = arith.constant 0 : i32
    %c0_i32_0 = arith.constant 0 : i32
    %c0_i32_1 = arith.constant 0 : i32
    return %c0_i32, %c0_i32_0 : i32, i32
  }
  func.func @transform_5(%arg0: i32) -> (i32, i32) {
    %c0_i32 = arith.constant 0 : i32
    %c0_i32_0 = arith.constant 0 : i32
    return %c0_i32, %arg0 : i32, i32
  }
}

</mosaic_0001>

<bundles_post_ra>
// kernel: tpu_custom_call.1
= control target key start
LH: loop header
LB: loop body
LE: loop exit
PB: predicated region body
PF: predicated region fallthrough
CT: control target
= control target key end

     0   :  { %vm135_vm0 = vcmask 261120   ;;  %v629_v3 = vmov 0   ;;  %s807_s0 = inlined_call_operand.vmem [shape: f32[8,32], index: 0, kind: input, shape index: {}]   ;;  %s808_s1 = inlined_call_operand.vmem [shape: f32[128,32], index: 1, kind: input, shape index: {}]   ;;  %s809_s2 = inlined_call_operand.vmem [shape: f32[128,1], index: 2, kind: input, shape index: {}]   ;;  %s810_s3 = inlined_call_operand.vmem [shape: f32[1,128], index: 3, kind: input, shape index: {}]   ;;  %s811_s4 = inlined_call_operand.<no memory space> [shape: f32[1,1], index: 4, kind: input, shape index: {}]   ;;  %s812_s5 = inlined_call_operand.hbm [shape: f32[1,8], index: 5, kind: output, shape index: {}]  }
   0x1   :  { %v38_v0 = vld [vmem:[%s807_s0] sm:$0xff]  ;;  %v23_v2 = vld [vmem:[%s808_s1 + $0x8] sm:$0xff]  ;;  %599 = vset.pattern.permute.xlu0 %v629_v3  ;;  %v24_v4 = vld [vmem:[%s808_s1 + $0x10] sm:$0xff]  ;;  %600 = vset.pattern.permute.xlu1 %v629_v3 }
   0x2   :  { %v22_v1 = vld [vmem:[%s808_s1] sm:$0xff]  ;;  %509 = vmatprep.subr.msk.mxu0 %vm135_vm0, %v38_v0  ;;  %v25_v6 = vld [vmem:[%s808_s1 + $0x18] sm:$0xff]  ;;  %v41_v7 = vld [vmem:[%s809_s2 + $0x10] sm:$0xff] }
   0x3   :  { %511 = vmatprep.mubr.msk.f32.mxu0 %vm135_vm0, %v22_v1  ;;  %510 = vmatpush3.xpose.msk.msra.mxu0 %vm135_vm0, %v38_v0  ;;  %v39_v5 = vld [vmem:[%s809_s2] sm:$0xff]  ;;  %v40_v9 = vld [vmem:[%s809_s2 + $0x8] sm:$0xff]  ;;  %v42_v10 = vld [vmem:[%s809_s2 + $0x18] sm:$0xff] }
   0x4   :  { %57 = vperm.xlu0 %599, %v39_v5   ;;  %v26_v8 = vld [vmem:[%s808_s1 + $0x20] sm:$0xff]  ;;  %67 = vperm.xlu1 %600, %v41_v7   ;;  %v27_v11 = vld [vmem:[%s808_s1 + $0x28] sm:$0xff]  ;;  %v28_v12 = vld [vmem:[%s808_s1 + $0x30] sm:$0xff] }
   0x5   :  { %v43_v13 = vld [vmem:[%s809_s2 + $0x20] sm:$0xff] }
   0x6   :  { %512 = vmatmul.mubr.msk.f32.vlgmr.msra.gmra.mrb[0].mxu0 %vm135_vm0, %v23_v2 }
   0x7   :  { %514 = vmatprep.mubr.msk.f32.mxu0 %vm135_vm0, %v24_v4 }
   0x8   :  { %62 = vperm.xlu0 %599, %v40_v9   ;;  %72 = vperm.xlu1 %600, %v42_v10  }
   0xa   :  { %515 = vmatmul.mubr.msk.f32.gmra.mrb[2].mxu0 %vm135_vm0, %v25_v6 }
   0xb   :  { %517 = vmatprep.mubr.msk.f32.mxu0 %vm135_vm0, %v26_v8 }
   0xc   :  { %11 = vsyncpa [#allocation4], 0  ;;  %v44_v14 = vld [vmem:[%s809_s2 + $0x28] sm:$0xff]  ;;  %v29_v15 = vld [vmem:[%s808_s1 + $0x38] sm:$0xff]  ;;  %77 = vperm.xlu0 %599, %v43_v13   ;;  %v630_v34 = vmov 0.0|0.0   ;;  %vm631_vm1 = vmmov 0  }
   0xd   :  { %v30_v16 = vld [vmem:[%s808_s1 + $0x40] sm:$0xff]  ;;  %82 = vperm.xlu1 %600, %v44_v14   ;;  %v45_v17 = vld [vmem:[%s809_s2 + $0x30] sm:$0xff]  ;;  %v46_v18 = vld [vmem:[%s809_s2 + $0x38] sm:$0xff]  ;;  %570 = vmatprep.subr.bf16.mxu1 %v630_v34  ;;  %v632_v35 = vmov 0.0   ;;  %s633_s8 = smov [#allocation3]   ;;  %vm442_vm2 = vcmask 57344  }
   0xe   :  { %518 = vmatmul.mubr.msk.f32.gmra.mrb[4].mxu0 %vm135_vm0, %v27_v11  ;;  %v31_v19 = vld [vmem:[%s808_s1 + $0x48] sm:$0xff]  ;;  %v32_v20 = vld [vmem:[%s808_s1 + $0x50] sm:$0xff]  ;;  %v47_v21 = vld [vmem:[%s809_s2 + $0x40] sm:$0xff]  ;;  %567 = vmatprep.mubr.msk.f32.mxu1 %vm631_vm1, %v632_v35  ;;  %s450_s9 = sshll.u32 %s633_s8, 4  ;;  %s451_s9 = int_to_ptr.vmem [resolvable:$true] %s450_s9 }
   0xf   :  { %520 = vmatprep.mubr.msk.f32.mxu0 %vm135_vm0, %v28_v12  ;;  %v48_v22 = vld [vmem:[%s809_s2 + $0x48] sm:$0xff]  ;;  %v33_v23 = vld [vmem:[%s808_s1 + $0x58] sm:$0xff]  ;;  %v34_v24 = vld [vmem:[%s808_s1 + $0x60] sm:$0xff]  ;;  %s609_s10 = scalar_lea.vmem %s451_s9, 32  ;;  %p610_p1 = scmp.lt.s32.totalorder %s451_s9, %s451_s9 }
  0x10   :  { %87 = vperm.xlu0 %599, %v45_v17   ;;  %v49_v25 = vld [vmem:[%s809_s2 + $0x50] sm:$0xff]  ;;  %v50_v26 = vld [vmem:[%s809_s2 + $0x58] sm:$0xff]  ;;  %v35_v27 = vld [vmem:[%s808_s1 + $0x68] sm:$0xff] }
  0x11   :  { %92 = vperm.xlu1 %600, %v46_v18   ;;  %v36_v28 = vld [vmem:[%s808_s1 + $0x70] sm:$0xff]  ;;  %v51_v29 = vld [vmem:[%s809_s2 + $0x60] sm:$0xff]  ;;  %v52_v30 = vld [vmem:[%s809_s2 + $0x68] sm:$0xff] }
  0x12   :  { %521 = vmatmul.mubr.msk.f32.gmra.mrb[6].mxu0 %vm135_vm0, %v29_v15  ;;  %v37_v31 = vld [vmem:[%s808_s1 + $0x78] sm:$0xff]  ;;  %v53_v32 = vld [vmem:[%s809_s2 + $0x70] sm:$0xff] }
  0x13   :  { %523 = vmatprep.mubr.msk.f32.mxu0 %vm135_vm0, %v30_v16  ;;  %v54_v33 = vld [vmem:[%s809_s2 + $0x78] sm:$0xff] }
  0x14   :  { %97 = vperm.xlu0 %599, %v47_v21  }
  0x15   :  { %102 = vperm.xlu1 %600, %v48_v22  }
  0x16   :  { %524 = vmatmul.mubr.msk.f32.gmra.mrb[8].mxu0 %vm135_vm0, %v31_v19 }
  0x17   :  { %526 = vmatprep.mubr.msk.f32.mxu0 %vm135_vm0, %v32_v20 }
  0x18   :  { %107 = vperm.xlu0 %599, %v49_v25  }
  0x19   :  { %112 = vperm.xlu1 %600, %v50_v26  }
  0x1a   :  { %527 = vmatmul.mubr.msk.f32.gmra.mrb[10].mxu0 %vm135_vm0, %v33_v23 }
  0x1b   :  { %529 = vmatprep.mubr.msk.f32.mxu0 %vm135_vm0, %v34_v24 }
  0x1c   :  { %117 = vperm.xlu0 %599, %v51_v29  }
  0x1d   :  { %122 = vperm.xlu1 %600, %v52_v30  }
  0x1e   :  { %530 = vmatmul.mubr.msk.f32.gmra.mrb[12].mxu0 %vm135_vm0, %v35_v27 }
  0x1f   :  { %532 = vmatprep.mubr.msk.f32.mxu0 %vm135_vm0, %v36_v28 }
  0x20   :  { %127 = vperm.xlu0 %599, %v53_v32  }
  0x21   :  { %132 = vperm.xlu1 %600, %v54_v33  }
  0x22   :  { %533 = vmatmul.mubr.msk.f32.gmra.mrb[14].mxu0 %vm135_vm0, %v37_v31 }
  0x83   :  { %v68_v36 = vpop.permute.xlu1 %67  ;;  %v58_v37 = vpop.permute.xlu0 %57 }
  0x87   :  { %v73_v38 = vpop.permute.xlu1 %72  ;;  %v63_v39 = vpop.permute.xlu0 %62 }
  0x8b   :  { %v78_v41 = vpop.permute.xlu0 %77 }
  0x8c   :  { %v83_v40 = vpop.permute.xlu1 %82 }
  0x8f   :  { %v88_v50 = vpop.permute.xlu0 %87 }
  0x90   :  { %v93_v47 = vpop.permute.xlu1 %92 }
  0x93   :  { %v98_v2 = vpop.permute.xlu0 %97 }
  0x94   :  { %v103_v63 = vpop.permute.xlu1 %102 }
  0x97   :  { %v108_v17 = vpop.permute.xlu0 %107 }
  0x98   :  { %v113_v13 = vpop.permute.xlu1 %112 }
  0x9b   :  { %v118_v33 = vpop.permute.xlu0 %117 }
  0x9c   :  { %v123_v30 = vpop.permute.xlu1 %122 }
  0xd9   :  { %v513_v42 = vpop.f32.mrb[0].mxu0 }
  0xda   :  { %v259_v43 = vadd.f32 %v513_v42, %v63_v39  ;;  %v253_v44 = vpop.f32.mrb[1].mxu0 }
  0xdb   :  { %v254_v45 = vadd.f32 %v253_v44, %v58_v37 }
  0xdc   :  { %v333_v46 = vmul.f32 0.1, %v259_v43 }
  0xdd   :  { %v332_v48 = vmul.f32 0.1, %v254_v45  ;;  %v516_v49 = vpop.f32.mrb[2].mxu0 }
  0xde   :  { %v349_v51 = vmax.f32 %v259_v43, %v333_v46  ;;  %v269_v52 = vadd.f32 %v516_v49, %v73_v38  ;;  %v263_v53 = vpop.f32.mrb[3].mxu0  ;;  %v128_v49 = vpop.permute.xlu0 %127 }
  0xdf   :  { %v348_v54 = vmax.f32 %v254_v45, %v332_v48  ;;  %v264_v55 = vadd.f32 %v263_v53, %v68_v36  ;;  %v133_v45 = vpop.permute.xlu1 %132 }
  0xe0   :  { %v335_v56 = vmul.f32 0.1, %v269_v52 }
  0xe1   :  { %v334_v57 = vmul.f32 0.1, %v264_v55  ;;  %v519_v58 = vpop.f32.mrb[4].mxu0  ;;  %v571_v59 = vpack.c.bf16 %v349_v51, %v348_v54 }
  0xe2   :  { %v351_v60 = vmax.f32 %v269_v52, %v335_v56  ;;  %v279_v61 = vadd.f32 %v519_v58, %v83_v40  ;;  %v273_v62 = vpop.f32.mrb[5].mxu0 }
  0xe3   :  { %v350_v0 = vmax.f32 %v264_v55, %v334_v57  ;;  %v274_v1 = vadd.f32 %v273_v62, %v78_v41  ;;  %572 = vmatpush3.bf16.msra.mxu1 %v571_v59  ;;  %v366_v62 = vstv %s811_s4 }
  0xe4   :  { %v337_v3 = vmul.f32 0.1, %v279_v61  ;;  %573 = vmatprep.subr.bf16.mxu1 %v630_v34 }
  0xe5   :  { %v336_v4 = vmul.f32 0.1, %v274_v1  ;;  %v522_v5 = vpop.f32.mrb[6].mxu0  ;;  %v574_v6 = vpack.c.bf16 %v351_v60, %v350_v0 }
  0xe6   :  { %v353_v7 = vmax.f32 %v279_v61, %v337_v3  ;;  %v289_v8 = vadd.f32 %v522_v5, %v93_v47  ;;  %v283_v9 = vpop.f32.mrb[7].mxu0  ;;  %v364_v61 = vld [vmem:[%s810_s3] sm:$0x1]  ;;  %s605_s3 = scalar_lea.vmem %s451_s9, 16 }
  0xe7   :  { %v352_v10 = vmax.f32 %v274_v1, %v336_v4  ;;  %v284_v11 = vadd.f32 %v283_v9, %v88_v50  ;;  %575 = vmatpush3.bf16.msra.mxu1 %v574_v6  ;;  %p606_p0 = scmp.ne.s32.totalorder %s451_s9, %s605_s3  ;;  %p611_p2 = scmp.lt.s32.totalorder %s609_s10, %s605_s3 }
  0xe8   :  { %v339_v12 = vmul.f32 0.1, %v289_v8  ;;  %576 = vmatprep.subr.bf16.mxu1 %v630_v34 }
  0xe9   :  { %v338_v14 = vmul.f32 0.1, %v284_v11  ;;  %v525_v15 = vpop.f32.mrb[8].mxu0  ;;  %v577_v16 = vpack.c.bf16 %v353_v7, %v352_v10  ;;  %p612_p3 = por %p611_p2, %p610_p1 }
  0xea   :  { %v355_v18 = vmax.f32 %v289_v8, %v339_v12  ;;  %v299_v19 = vadd.f32 %v525_v15, %v103_v63  ;;  %v293_v20 = vpop.f32.mrb[9].mxu0 }
  0xeb   :  { %v354_v21 = vmax.f32 %v284_v11, %v338_v14  ;;  %v294_v22 = vadd.f32 %v293_v20, %v98_v2  ;;  %578 = vmatpush3.bf16.msra.mxu1 %v577_v16  ;;  %p613_p4 = pnand %p612_p3, %p606_p0 }
  0xec   :  { %v341_v23 = vmul.f32 0.1, %v299_v19  ;;  %579 = vmatprep.subr.bf16.mxu1 %v630_v34 }
  0xed   :  { %v340_v24 = vmul.f32 0.1, %v294_v22  ;;  %v528_v25 = vpop.f32.mrb[10].mxu0  ;;  %v580_v26 = vpack.c.bf16 %v355_v18, %v354_v21 }
  0xee   :  { %v357_v27 = vmax.f32 %v299_v19, %v341_v23  ;;  %v309_v28 = vadd.f32 %v528_v25, %v113_v13  ;;  %v303_v29 = vpop.f32.mrb[11].mxu0 }
  0xef   :  { %v356_v31 = vmax.f32 %v294_v22, %v340_v24  ;;  %v304_v32 = vadd.f32 %v303_v29, %v108_v17  ;;  %581 = vmatpush3.bf16.msra.mxu1 %v580_v26 }
  0xf0   :  { %v343_v35 = vmul.f32 0.1, %v309_v28  ;;  %582 = vmatprep.subr.bf16.mxu1 %v630_v34 }
  0xf1   :  { %v342_v36 = vmul.f32 0.1, %v304_v32  ;;  %v531_v37 = vpop.f32.mrb[12].mxu0  ;;  %v583_v38 = vpack.c.bf16 %v357_v27, %v356_v31 }
  0xf2   :  { %v359_v39 = vmax.f32 %v309_v28, %v343_v35  ;;  %v319_v40 = vadd.f32 %v531_v37, %v123_v30  ;;  %v313_v41 = vpop.f32.mrb[13].mxu0 }
  0xf3   :  { %v358_v42 = vmax.f32 %v304_v32, %v342_v36  ;;  %v314_v43 = vadd.f32 %v313_v41, %v118_v33  ;;  %584 = vmatpush3.bf16.msra.mxu1 %v583_v38 }
  0xf4   :  { %v345_v44 = vmul.f32 0.1, %v319_v40  ;;  %585 = vmatprep.subr.bf16.mxu1 %v630_v34 }
  0xf5   :  { %v344_v46 = vmul.f32 0.1, %v314_v43  ;;  %v534_v47 = vpop.f32.mrb[14].mxu0  ;;  %v586_v48 = vpack.c.bf16 %v359_v39, %v358_v42 }
  0xf6   :  { %v361_v50 = vmax.f32 %v319_v40, %v345_v44  ;;  %v329_v51 = vadd.f32 %v534_v47, %v133_v45  ;;  %v323_v52 = vpop.f32.mrb[15].mxu0 }
  0xf7   :  { %v360_v53 = vmax.f32 %v314_v43, %v344_v46  ;;  %v324_v54 = vadd.f32 %v323_v52, %v128_v49  ;;  %587 = vmatpush3.bf16.msra.mxu1 %v586_v48 }
  0xf8   :  { %v347_v55 = vmul.f32 0.1, %v329_v51  ;;  %588 = vmatprep.subr.bf16.mxu1 %v630_v34 }
  0xf9   :  { %v346_v56 = vmul.f32 0.1, %v324_v54  ;;  %v589_v57 = vpack.c.bf16 %v361_v50, %v360_v53 }
  0xfa   :  { %v363_v58 = vmax.f32 %v329_v51, %v347_v55 }
  0xfb   :  { %v362_v59 = vmax.f32 %v324_v54, %v346_v56  ;;  %590 = vmatpush3.bf16.msra.mxu1 %v589_v57 }
  0xfc   :  { %591 = vmatprep.subr.bf16.mxu1 %v630_v34 }
  0xfd   :  { %v592_v60 = vpack.c.bf16 %v363_v58, %v362_v59 }
  0xff   :  { %593 = vmatpush3.bf16.msra.mxu1 %v592_v60 }
 0x102   :  { %568 = vmatmul.mubr.f32.vlgmr.msra.gmra.mrb[0].mxu1 %v364_v61 }
 0x1d5   :  { %v433_v63 = vpop.f32.mrb[0].mxu1 }
 0x1d6   :  { %v434_v0 = vadd.f32 %v433_v63, %v366_v62  ;;  %v569_v1 = vpop.f32.mrb[1].mxu1 }
 0x1d8   :  { %v437_v2 = vsub.f32 0.0, %v434_v0 }
 0x1da   :  { %v438_v3 = vmul.f32 1.442695, %v437_v2 }
 0x1dc   :  { %601 = vpow2.f32 %v438_v3 }
 0x1e6   :  { %v602_v4 = vpop.eup %601 }
 0x1e7   :  { %v440_v5 = vadd.f32 1.0, %v602_v4 }
 0x1e9   :  { %603 = vrcp.f32 %v440_v5 }
 0x1f3   :  { %v604_v34 = vpop.eup %603 }
 0x1f4   :  { %443 = vst.msk [vmem:[#allocation3] sm:$0x1] %vm442_vm2, %v604_v34 }
 0x1f5   :  { %616 = shalt.err (!%p613_p4)
}
 0x1f6   :  { %s617_s12 = scalar_lea.hbm %s812_s5, 16 }
 0x1f7   :  { %p618_p5 = scmp.ne.s32.totalorder %s812_s5, %s617_s12  ;;  %p621_p6 = scmp.lt.u32.totalorder %s617_s12, %s812_s5 }
 0x1f9   :  { %p623_p7 = pnand %p621_p6, %p618_p5 }
 0x1fb   :  { %626 = shalt.err (!%p623_p7)
}
 0x1fc   :  { %453 = dma.vmem_to_hbm [thread:$0]  %s451_s9, 16, %s812_s5, [#allocation4]  }
 0x1fd   :  { %627 = dma.done.wait [#allocation4], 16  }
 0x1fe   :  { %628 = vsyncadd [#allocation4], 4294967280 }
 0x1ff   :  { %457 = vsyncpa [#allocation4], 1 }

</bundles_post_ra>
